<compile_context>
chip_gen: v6e
topology: v6e:2x2x1
jax: 0.10.0
libtpu: 0.0.40
codegen_flags: <defaults>
</compile_context>

<pallas_src>
import functools

import jax
import jax.numpy as jnp
from jax.experimental import pallas as pl
from jax.experimental.pallas import tpu as pltpu


def _round_up(n, m):
    return ((n + m - 1) // m) * m


def _pick_bblk(B, cap):
    """Largest divisor of B that fits the VMEM budget, preferring >= 2 grid steps
    so the parallel batch axis can feed both TensorCores on v7x."""
    divs = [d for d in range(1, B + 1) if B % d == 0 and d <= cap]
    if not divs:
        return 1
    two_step = [d for d in divs if B // d >= 2]
    return max(two_step) if two_step else max(divs)


# --------------------------------------------------------------------------------------
# Single-pass kernel: the whole (BBLK, C, L) slab sits in VMEM, squeeze + excitation +
# scale are fused so x is read from HBM exactly once and written exactly once.
# --------------------------------------------------------------------------------------
def _se_fused_kernel(x_ref, w1t_ref, w2t_ref, o_ref, *, inv_len):
    x = x_ref[...]                                                      # (BBLK, C, L)
    # Squeeze: f32-accumulating sum over the lane (length) axis, scaled by 1/L_orig
    # (zero padding along L contributes nothing, so the mean stays exact).
    y = jnp.sum(x, axis=-1, dtype=jnp.float32) * inv_len                # (BBLK, C)
    # Excitation: two bias-free linears batched over BBLK rows (lane-padded Cr).
    h = jnp.dot(y, w1t_ref[...], preferred_element_type=jnp.float32)    # (BBLK, Crp)
    h = jnp.maximum(h, 0.0)
    s = jnp.dot(h, w2t_ref[...], preferred_element_type=jnp.float32)    # (BBLK, C)
    s = jax.nn.sigmoid(s)
    # Scale: broadcast the per-(batch, channel) gate over L.
    o_ref[...] = (x * s.astype(x.dtype)[:, :, None]).astype(o_ref.dtype)


def _se_single_pass(xp, w1, w2, L_orig, vmem_budget_bytes):
    B, C_pad, L_pad = xp.shape
    Cr, C = w1.shape
    itemsize = xp.dtype.itemsize

    # Zero-pad the excitation weights: channels to C_pad, bottleneck to a lane multiple.
    Cr_pad = _round_up(Cr, 128)
    w1p = jnp.pad(w1, ((0, Cr_pad - Cr), (0, C_pad - C)))               # (Cr_pad, C_pad)
    w2p = jnp.pad(w2, ((0, C_pad - C), (0, Cr_pad - Cr)))               # (C_pad, Cr_pad)
    w1t = w1p.T                                                         # (C_pad, Cr_pad)
    w2t = w2p.T                                                         # (Cr_pad, C_pad)

    slab = C_pad * L_pad * itemsize                     # one batch element, one buffer
    cap = max(1, vmem_budget_bytes // (4 * slab))       # 2 buffers x (in + out)
    bblk = _pick_bblk(B, cap)
    grid_b = B // bblk

    w_bytes = (w1t.size + w2t.size) * w1t.dtype.itemsize
    vmem_limit = int(min(100 << 20, max(48 << 20, 4 * bblk * slab + 4 * w_bytes + (4 << 20))))

    cost = pl.CostEstimate(
        flops=2 * B * C_pad * L_pad + 4 * B * C_pad * Cr_pad,
        transcendentals=B * C_pad,
        bytes_accessed=2 * B * C_pad * L_pad * itemsize + w_bytes,
    )

    kernel = functools.partial(_se_fused_kernel, inv_len=float(1.0 / L_orig))

    return pl.pallas_call(
        kernel,
        out_shape=jax.ShapeDtypeStruct((B, C_pad, L_pad), xp.dtype),
        grid_spec=pltpu.PrefetchScalarGridSpec(
            num_scalar_prefetch=0,
            grid=(grid_b,),
            in_specs=[
                pl.BlockSpec((bblk, C_pad, L_pad), lambda b: (b, 0, 0)),
                pl.BlockSpec((C_pad, Cr_pad), lambda b: (0, 0)),
                pl.BlockSpec((Cr_pad, C_pad), lambda b: (0, 0)),
            ],
            out_specs=pl.BlockSpec((bblk, C_pad, L_pad), lambda b: (b, 0, 0)),
        ),
        compiler_params=pltpu.CompilerParams(
            dimension_semantics=("parallel",),
            vmem_limit_bytes=vmem_limit,
        ),
        cost_estimate=cost,
    )(xp, w1t, w2t)


# --------------------------------------------------------------------------------------
# Two-pass fallback for sequences whose (C, L) slab cannot fit VMEM:
#   pass 1: L-tiled squeeze (mean over L, f32 accumulator resident across the L axis),
#   excitation MLP on the tiny (B, C) tensor in plain XLA,
#   pass 2: L-tiled scale (x * gate), fully parallel grid.
# --------------------------------------------------------------------------------------
def _squeeze_kernel(x_ref, y_ref, acc_ref, *, inv_len):
    l = pl.program_id(1)

    @pl.when(l == 0)
    def _init():
        acc_ref[...] = jnp.zeros_like(acc_ref)

    acc_ref[...] += jnp.sum(x_ref[...], axis=-1, dtype=jnp.float32)     # (1, C)

    @pl.when(l == pl.num_programs(1) - 1)
    def _finish():
        y_ref[...] = (acc_ref[...] * inv_len)[:, :, None]               # (1, C, 1)


def _scale_kernel(x_ref, g_ref, o_ref):
    x = x_ref[...]                                                      # (1, C, Lt)
    o_ref[...] = (x * g_ref[...].astype(x.dtype)).astype(o_ref.dtype)   # gate: (1, C, 1)


def _se_two_pass(xp, w1, w2, L_orig, vmem_budget_bytes):
    B, C_pad, L_pad = xp.shape
    Cr, C = w1.shape
    itemsize = xp.dtype.itemsize

    # Pick an L tile (multiple of 128, divisor of L_pad) that fits the VMEM budget.
    nL = L_pad // 128
    tile128 = C_pad * 128 * itemsize
    cap_tiles = max(1, vmem_budget_bytes // (4 * tile128))
    d = max(dd for dd in range(1, nL + 1) if nL % dd == 0 and dd <= cap_tiles)
    Ltile = d * 128
    grid_l = nL // d

    squeeze_cost = pl.CostEstimate(
        flops=B * C_pad * L_pad,
        transcendentals=0,
        bytes_accessed=B * C_pad * L_pad * itemsize + B * C_pad * 4,
    )
    y_col = pl.pallas_call(
        functools.partial(_squeeze_kernel, inv_len=float(1.0 / L_orig)),
        out_shape=jax.ShapeDtypeStruct((B, C_pad, 1), jnp.float32),
        grid_spec=pltpu.PrefetchScalarGridSpec(
            num_scalar_prefetch=0,
            grid=(B, grid_l),
            in_specs=[pl.BlockSpec((1, C_pad, Ltile), lambda b, l: (b, 0, l))],
            out_specs=pl.BlockSpec((1, C_pad, 1), lambda b, l: (b, 0, 0)),
            scratch_shapes=[pltpu.VMEM((1, C_pad), jnp.float32)],
        ),
        compiler_params=pltpu.CompilerParams(
            dimension_semantics=("parallel", "arbitrary"),
            vmem_limit_bytes=48 << 20,
        ),
        cost_estimate=squeeze_cost,
    )(xp)

    # Excitation on the tiny (B, C) tensor: negligible work, do it in plain XLA.
    y = y_col[:, :C, 0]                                                 # (B, C) f32
    h = jnp.maximum(y @ w1.T.astype(jnp.float32), 0.0)                  # (B, Cr)
    s = jax.nn.sigmoid(h @ w2.T.astype(jnp.float32))                    # (B, C)
    gate = jnp.pad(s, ((0, 0), (0, C_pad - C)))[:, :, None]             # (B, C_pad, 1) f32

    scale_cost = pl.CostEstimate(
        flops=B * C_pad * L_pad,
        transcendentals=0,
        bytes_accessed=2 * B * C_pad * L_pad * itemsize + B * C_pad * 4,
    )
    return pl.pallas_call(
        _scale_kernel,
        out_shape=jax.ShapeDtypeStruct((B, C_pad, L_pad), xp.dtype),
        grid_spec=pltpu.PrefetchScalarGridSpec(
            num_scalar_prefetch=0,
            grid=(B, grid_l),
            in_specs=[
                pl.BlockSpec((1, C_pad, Ltile), lambda b, l: (b, 0, l)),
                pl.BlockSpec((1, C_pad, 1), lambda b, l: (b, 0, 0)),
            ],
            out_specs=pl.BlockSpec((1, C_pad, Ltile), lambda b, l: (b, 0, l)),
        ),
        compiler_params=pltpu.CompilerParams(
            dimension_semantics=("parallel", "parallel"),
            vmem_limit_bytes=48 << 20,
        ),
        cost_estimate=scale_cost,
    )(xp, gate)


# --------------------------------------------------------------------------------------
# Public wrapper
# --------------------------------------------------------------------------------------
def se_attention(x, w1, w2, *, vmem_budget_bytes=40 * 1024 * 1024):
    """x: (B, C, L); w1: (C//r, C); w2: (C, C//r)  (PyTorch Linear weight convention)."""
    B, C, L = x.shape
    itemsize = x.dtype.itemsize

    # Lane / sublane alignment: pad in the wrapper, slice after. Zero padding keeps the
    # mean (divided by the ORIGINAL L) and the gate exact.
    sublane = {4: 8, 2: 16, 1: 32}.get(itemsize, 8)
    L_pad = _round_up(L, 128)
    C_pad = _round_up(C, sublane)
    padded = (L_pad != L) or (C_pad != C)
    xp = jnp.pad(x, ((0, 0), (0, C_pad - C), (0, L_pad - L))) if padded else x

    slab = C_pad * L_pad * itemsize
    if 4 * slab <= vmem_budget_bytes:
        out = _se_single_pass(xp, w1, w2, L, vmem_budget_bytes)
    else:
        out = _se_two_pass(xp, w1, w2, L, vmem_budget_bytes)

    if padded:
        out = out[:, :C, :L]
    return out


def se_attention_ref(x, w1, w2):
    y = jnp.mean(x, axis=2)                      # (B, C)
    h = jnp.maximum(y @ w1.T, 0.0)               # (B, C/r)
    s = jax.nn.sigmoid(h @ w2.T)                 # (B, C)
    return x * s[:, :, None]


if __name__ == "__main__":
    key = jax.random.PRNGKey(0)

    # Case 1: aligned shapes (channel=64, reduction=16, length=128), single-pass path.
    B, C, L = 2, 64, 128
    Cr = C // 16
    kx, k1, k2, key = jax.random.split(key, 4)
    x = jax.random.normal(kx, (B, C, L), dtype=jnp.float32)
    w1 = jax.random.normal(k1, (Cr, C), dtype=jnp.float32) * (1.0 / jnp.sqrt(C))
    w2 = jax.random.normal(k2, (C, Cr), dtype=jnp.float32) * (1.0 / jnp.sqrt(Cr))

    out = jax.block_until_ready(se_attention(x, w1, w2))
    ref = se_attention_ref(x, w1, w2)
    assert out.shape == (B, C, L)
    assert jnp.allclose(out, ref, atol=1e-5, rtol=1e-5), "mismatch vs reference (case 1)"

    # Case 2: unaligned length + batched block (exercises padding and BBLK > 1).
    B2, C2, L2 = 4, 32, 96
    Cr2 = C2 // 16
    kx, k1, k2, key = jax.random.split(key, 4)
    x2 = jax.random.normal(kx, (B2, C2, L2), dtype=jnp.float32)
    w1b = jax.random.normal(k1, (Cr2, C2), dtype=jnp.float32) * (1.0 / jnp.sqrt(C2))
    w2b = jax.random.normal(k2, (C2, Cr2), dtype=jnp.float32) * (1.0 / jnp.sqrt(Cr2))

    out2 = jax.block_until_ready(se_attention(x2, w1b, w2b))
    ref2 = se_attention_ref(x2, w1b, w2b)
    assert out2.shape == (B2, C2, L2)
    assert jnp.allclose(out2, ref2, atol=1e-5, rtol=1e-5), "mismatch vs reference (case 2)"

    # Case 3: force the two-pass L-tiled fallback with an artificially tiny VMEM budget.
    B3, C3, L3 = 2, 32, 256
    Cr3 = C3 // 16
    kx, k1, k2, key = jax.random.split(key, 4)
    x3 = jax.random.normal(kx, (B3, C3, L3), dtype=jnp.float32)
    w1c = jax.random.normal(k1, (Cr3, C3), dtype=jnp.float32) * (1.0 / jnp.sqrt(C3))
    w2c = jax.random.normal(k2, (C3, Cr3), dtype=jnp.float32) * (1.0 / jnp.sqrt(Cr3))

    out3 = jax.block_until_ready(
        se_attention(x3, w1c, w2c, vmem_budget_bytes=96 * 1024))
    ref3 = se_attention_ref(x3, w1c, w2c)
    assert out3.shape == (B3, C3, L3)
    assert jnp.allclose(out3, ref3, atol=1e-5, rtol=1e-5), "mismatch vs reference (case 3)"

    print("KERNEL_OK")
</pallas_src>

<mosaic_0001>
module attributes {stable_mosaic.version = 11 : i64} {
  func.func @_se_fused_kernel(%arg0: i32, %arg1: memref<1x64x128xf32, #tpu.memory_space<vmem>>, %arg2: memref<64x128xf32, #tpu.memory_space<vmem>>, %arg3: memref<128x64xf32, #tpu.memory_space<vmem>>, %arg4: memref<1x64x128xf32, #tpu.memory_space<vmem>>) attributes {dimension_semantics = [#tpu.dimension_semantics<parallel>], iteration_bounds = array<i64: 2>, scalar_prefetch = 0 : i64, scratch_operands = 0 : i64, tpu.core_type = #tpu.core_type<tc>, window_params = [{transform_indices = @transform_0, window_bounds = array<i64: 1, 64, 128>}, {pipeline_mode = #tpu.pipeline_mode<synchronous>, transform_indices = @transform_1, window_bounds = array<i64: 64, 128>}, {pipeline_mode = #tpu.pipeline_mode<synchronous>, transform_indices = @transform_2, window_bounds = array<i64: 128, 64>}, {transform_indices = @transform_3, window_bounds = array<i64: 1, 64, 128>}]} {
    %c0 = arith.constant 0 : index
    %c0_0 = arith.constant 0 : index
    %c0_1 = arith.constant 0 : index
    %0 = vector.load %arg1[%c0, %c0_0, %c0_1] : memref<1x64x128xf32, #tpu.memory_space<vmem>>, vector<1x64x128xf32>
    %cst = arith.constant dense<0.000000e+00> : vector<1x64xf32>
    %1 = vector.multi_reduction <add>, %0, %cst [2] : vector<1x64x128xf32> to vector<1x64xf32>
    %cst_2 = arith.constant 7.812500e-03 : f32
    %2 = vector.broadcast %cst_2 : f32 to vector<1x64xf32>
    %3 = arith.mulf %1, %2 : vector<1x64xf32>
    %c0_3 = arith.constant 0 : index
    %c0_4 = arith.constant 0 : index
    %4 = vector.load %arg2[%c0_3, %c0_4] : memref<64x128xf32, #tpu.memory_space<vmem>>, vector<64x128xf32>
    %cst_5 = arith.constant dense<0.000000e+00> : vector<1x128xf32>
    %5 = tpu.matmul %3, %4, %cst_5 {dimension_numbers = #tpu.dot_dimension_numbers<[1], [0], [0], [1], [0, 0, 1, 1], [], []>} : vector<1x64xf32>, vector<64x128xf32>, vector<1x128xf32> -> vector<1x128xf32>
    %cst_6 = arith.constant 0.000000e+00 : f32
    %6 = vector.broadcast %cst_6 : f32 to vector<1x128xf32>
    %7 = arith.maximumf %5, %6 : vector<1x128xf32>
    %c0_7 = arith.constant 0 : index
    %c0_8 = arith.constant 0 : index
    %8 = vector.load %arg3[%c0_7, %c0_8] : memref<128x64xf32, #tpu.memory_space<vmem>>, vector<128x64xf32>
    %cst_9 = arith.constant dense<0.000000e+00> : vector<1x64xf32>
    %9 = tpu.matmul %7, %8, %cst_9 {dimension_numbers = #tpu.dot_dimension_numbers<[1], [0], [0], [1], [0, 0, 1, 1], [], []>} : vector<1x128xf32>, vector<128x64xf32>, vector<1x64xf32> -> vector<1x64xf32>
    %10 = arith.negf %9 : vector<1x64xf32>
    %11 = math.exp %10 : vector<1x64xf32>
    %cst_10 = arith.constant 1.000000e+00 : f32
    %12 = vector.broadcast %cst_10 : f32 to vector<1x64xf32>
    %13 = arith.addf %12, %11 : vector<1x64xf32>
    %14 = arith.divf %12, %13 : vector<1x64xf32>
    %15 = vector.shape_cast %14 : vector<1x64xf32> to vector<1x64x1xf32>
    %16 = vector.broadcast %15 : vector<1x64x1xf32> to vector<1x64x128xf32>
    %17 = arith.mulf %0, %16 : vector<1x64x128xf32>
    %c0_11 = arith.constant 0 : index
    %c0_12 = arith.constant 0 : index
    %c0_13 = arith.constant 0 : index
    %18 = vector.load %arg4[%c0_11, %c0_12, %c0_13] : memref<1x64x128xf32, #tpu.memory_space<vmem>>, vector<1x64x128xf32>
    tpu.vector_store %arg4[%c0_11, %c0_12, %c0_13], %17 {strides = array<i32>} : memref<1x64x128xf32, #tpu.memory_space<vmem>>, vector<1x64x128xf32>,
    return
  }
  func.func @transform_0(%arg0: i32) -> (i32, i32, i32) {
    %c0_i32 = arith.constant 0 : i32
    %c0_i32_0 = arith.constant 0 : i32
    %c0_i32_1 = arith.constant 0 : i32
    return %arg0, %c0_i32, %c0_i32_0 : i32, i32, i32
  }
  func.func @transform_1(%arg0: i32) -> (i32, i32) {
    %c0_i32 = arith.constant 0 : i32
    %c0_i32_0 = arith.constant 0 : i32
    %c0_i32_1 = arith.constant 0 : i32
    return %c0_i32, %c0_i32_0 : i32, i32
  }
  func.func @transform_2(%arg0: i32) -> (i32, i32) {
    %c0_i32 = arith.constant 0 : i32
    %c0_i32_0 = arith.constant 0 : i32
    %c0_i32_1 = arith.constant 0 : i32
    return %c0_i32, %c0_i32_0 : i32, i32
  }
  func.func @transform_3(%arg0: i32) -> (i32, i32, i32) {
    %c0_i32 = arith.constant 0 : i32
    %c0_i32_0 = arith.constant 0 : i32
    %c0_i32_1 = arith.constant 0 : i32
    return %arg0, %c0_i32, %c0_i32_0 : i32, i32, i32
  }
}

</mosaic_0001>

<bundles_post_ra>
// kernel: tpu_custom_call.1
= control target key start
LH: loop header
LB: loop body
LE: loop exit
PB: predicated region body
PF: predicated region fallthrough
CT: control target
= control target key end

     0   :  { %8 = vsyncpa [#allocation3], 0  ;;  %s1042_s0 = inlined_call_operand.vmem [shape: f32[2,64,128], index: 0, kind: input, shape index: {}]   ;;  %s1043_s1 = inlined_call_operand.vmem [shape: f32[64,128], index: 1, kind: input, shape index: {}]   ;;  %s1044_s2 = inlined_call_operand.vmem [shape: f32[128,64], index: 2, kind: input, shape index: {}]   ;;  %s1045_s3 = inlined_call_operand.hbm [shape: f32[2,64,128], index: 3, kind: output, shape index: {}]  }
   0x1   :  { %10 = vsyncpa [#allocation3 + $0x1], 0  ;;  %s795_s12 = smov 0   ;;  %s797_s13 = smov 0  }
   0x2   :  { %s799_s14 = smov 0   ;;  %s801_s15 = smov 0  }
   0x3 LB: > { %s816_s16 = sadd.s32 4294967295, %s768_s15   ;;  %s565_s17 = sadd.s32 4294967294, %s768_s15   ;;  %s768_s15 = sphi %s801_s15, %s1051_s15   ;;  %s764_s14 = sphi %s799_s14, %s1050_s14   ;;  %s760_s13 = sphi %s797_s13, %s1049_s13   ;;  %s756_s12 = sphi %s795_s12, %s1048_s12  }
   0x4   : > { %s820_s18 = sadd.s32 1, %s768_s15   ;;  %s91_s19 = sadd.s32 1, %s764_s14 }
   0x5   : > { %s88_s20 = ssub.s32 %s768_s15, %s820_s18  ;;  %p101_p0 = scmp.ne.s32.totalorder %s764_s14, %s760_s13 }
   0x6   : > { %p89_p1 = scmp.eq.s32.totalorder %s88_s20, 0  ;;  %p102_p2 = scmp.eq.s32.totalorder %s816_s16, 1 }
   0x7   : > { %p107_p3 = scmp.ne.s32.totalorder %s760_s13, %s756_s12  ;;  %p108_p4 = scmp.eq.s32.totalorder %s565_s17, 1 }
   0x8   : > { %s831_s21 = scalar_select %p89_p1, %s764_s14, %s91_s19  }
   0x9   : > { %p833_p5 = por %p102_p2, %p101_p0  ;;  %p837_p6 = por %p108_p4, %p107_p3 }
   0xa   : > { %p568_p7 = scmp.ge.s32.totalorder %s768_s15, 1  ;;  %p140_p8 = scmp.lt.s32.totalorder %s768_s15, 3 }
   0xc   : > { %p141_p9 = pnand %p568_p7, %p140_p8 }
   0xd   : > { %p164_p10 = scmp.lt.s32.totalorder (!%p141_p9), %s816_s16, 1  ;;  %s161_s20 = sand.u32 (!%p141_p9), 1, %s760_s13  }
   0xe   : > { %144 = sbr.rel (%p141_p9) target bundleno = 749 (0x2ed), region = 32  ;;  %s580_s26 = sshll.u32 (!%p141_p9), %s816_s16, 10 }
   0xf   : > { %s995_s30 = scalar_lea.hbm (!%p141_p9), %s1045_s3, %s580_s26  ;;  %s1002_s4 = scalar_lea.sflag (!%p141_p9), [#allocation3], %s161_s20 }
  0x10   : > { %s772_s5 = smov (!%p141_p9), [#allocation2]  }
  0x11   : > { %s712_s6 = sshll.u32 (!%p141_p9), %s772_s5, 4  ;;  %s713_s6 = int_to_ptr.vmem [resolvable:$false] %s712_s6 }
  0x12   : > { %s714_s7 = scalar_lea.vmem (!%p141_p9), %s713_s6, 2048 }
  0x13   : > { %s165_s24 = scalar_select %p164_p10, %s816_s16, 1  ;;  %v208_v8 = vld [vmem:[%s1043_s1 + $0x38] sm:$0xff]  ;;  %v770_v9 = vmov 0.0   ;;  %v207_v10 = vld [vmem:[%s1043_s1 + $0x30] sm:$0xff]  ;;  %v206_v11 = vld [vmem:[%s1043_s1 + $0x28] sm:$0xff]  ;;  %vm771_vm0 = vmmov 0   ;;  %v217_v31 = vlaneseq }
  0x14   : > { %607 = vmatprep.subr.mxu0 %v770_v9  ;;  %626 = vmatprep.subr.mxu1 %v770_v9  ;;  %v205_v12 = vld [vmem:[%s1043_s1 + $0x20] sm:$0xff]  ;;  %v204_v13 = vld [vmem:[%s1043_s1 + $0x18] sm:$0xff]  ;;  %v203_v14 = vld [vmem:[%s1043_s1 + $0x10] sm:$0xff]  ;;  %vm228_vm1 = vcmask 130112   ;;  %vm235_vm2 = vcmask 195712   ;;  %vm242_vm3 = vcmask 261312  }
  0x15   : > { %s579_s25 = sshll.u32 %s165_s24, 6  ;;  %608 = vmatpush3.msra.mxu0 %v208_v8  ;;  %v202_v15 = vld [vmem:[%s1043_s1 + $0x8] sm:$0xff]  ;;  %v201_v16 = vld [vmem:[%s1043_s1] sm:$0xff]  ;;  %623 = vmatprep.mubr.msk.f32.mxu0 %vm771_vm0, %v770_v9  ;;  %v361_v17 = vld [vmem:[%s1044_s2 + $0x78] sm:$0xff]  ;;  %v218_v32 = vand.u32 127, %v217_v31  ;;  %v963_v33 = vshrl.u32 %v217_v31, 7 }
  0x16   : > { %s168_s28 = scalar_lea.vmem %s1042_s0, %s579_s25  ;;  %609 = vmatprep.subr.mxu0 %v770_v9  ;;  %658 = vmatprep.mubr.msk.f32.mxu1 %vm771_vm0, %v770_v9  ;;  %v360_v18 = vld [vmem:[%s1044_s2 + $0x70] sm:$0xff]  ;;  %v359_v19 = vld [vmem:[%s1044_s2 + $0x68] sm:$0xff]  ;;  %v358_v20 = vld [vmem:[%s1044_s2 + $0x60] sm:$0xff]  ;;  %vm249_vm4 = vcmask 326912   ;;  %vm256_vm5 = vcmask 392512   ;;  %vm263_vm6 = vcmask 458112  }
  0x17   : > { %v848_v0 = vld [vmem:[%s168_s28] sm:$0xff]  ;;  %v850_v1 = vld [vmem:[%s168_s28 + $0x10] sm:$0xff]  ;;  %v854_v2 = vld [vmem:[%s168_s28 + $0x8] sm:$0xff]  ;;  %610 = vmatpush3.msra.mxu0 %v207_v10  ;;  %627 = vmatpush3.msra.mxu1 %v361_v17  ;;  %v223_v34 = vadd.s32 4294967288, %v218_v32  ;;  %v237_v35 = vadd.s32 4294967272, %v218_v32  ;;  %v230_v37 = vadd.s32 4294967280, %v218_v32  ;;  %v221_v40 = vsub.s32 %v218_v32, %v963_v33 }
  0x18   : > { %177 = vadd.xlane.f32.xlu0 %v848_v0  ;;  %181 = vadd.xlane.f32.xlu1 %v850_v1  ;;  %v856_v3 = vld [vmem:[%s168_s28 + $0x18] sm:$0xff]  ;;  %v860_v4 = vld [vmem:[%s168_s28 + $0x20] sm:$0xff]  ;;  %v862_v5 = vld [vmem:[%s168_s28 + $0x28] sm:$0xff]  ;;  %v244_v39 = vadd.s32 4294967264, %v218_v32  ;;  %v251_v48 = vadd.s32 4294967256, %v218_v32  ;;  %v258_v52 = vadd.s32 4294967248, %v218_v32 }
  0x19   : > { %v866_v6 = vld [vmem:[%s168_s28 + $0x30] sm:$0xff]  ;;  %v868_v7 = vld [vmem:[%s168_s28 + $0x38] sm:$0xff]  ;;  %611 = vmatprep.subr.mxu0 %v770_v9  ;;  %628 = vmatprep.subr.mxu1 %v770_v9  ;;  %v355_v23 = vld [vmem:[%s1044_s2 + $0x48] sm:$0xff]  ;;  %v226_v42 = vsub.s32 %v223_v34, %v963_v33  ;;  %v240_v43 = vsub.s32 %v237_v35, %v963_v33  ;;  %v233_v44 = vsub.s32 %v230_v37, %v963_v33  ;;  %v265_v56 = vadd.s32 4294967240, %v218_v32  ;;  %s569_s24 = sshll.u32 %s161_s20, 6 }
  0x1a   : > { %612 = vmatpush3.msra.mxu0 %v206_v11  ;;  %629 = vmatpush3.msra.mxu1 %v360_v18  ;;  %v357_v21 = vld [vmem:[%s1044_s2 + $0x58] sm:$0xff]  ;;  %v356_v22 = vld [vmem:[%s1044_s2 + $0x50] sm:$0xff]  ;;  %v354_v24 = vld [vmem:[%s1044_s2 + $0x40] sm:$0xff]  ;;  %v247_v51 = vsub.s32 %v244_v39, %v963_v33  ;;  %v254_v59 = vsub.s32 %v251_v48, %v963_v33  ;;  %vm270_vm7 = vcmask 523712   ;;  %vm272_vm8 = vcmask 523264   ;;  %s163_s25 = scalar_lea.vmem [#allocation2], %s569_s24 }
  0x1b   : > { %613 = vmatprep.subr.mxu0 %v770_v9  ;;  %630 = vmatprep.subr.mxu1 %v770_v9  ;;  %v353_v25 = vld [vmem:[%s1044_s2 + $0x38] sm:$0xff]  ;;  %v352_v26 = vld [vmem:[%s1044_s2 + $0x30] sm:$0xff]  ;;  %v351_v27 = vld [vmem:[%s1044_s2 + $0x28] sm:$0xff]  ;;  %s503_s27 = sshll.u32 %s163_s25, 4  ;;  %s997_s27 = int_to_ptr.vmem [resolvable:$true] %s503_s27 }
  0x1c   : > { %179 = vadd.xlane.f32.xlu0 %v854_v2  ;;  %183 = vadd.xlane.f32.xlu1 %v856_v3  ;;  %v350_v28 = vld [vmem:[%s1044_s2 + $0x20] sm:$0xff]  ;;  %v349_v29 = vld [vmem:[%s1044_s2 + $0x18] sm:$0xff]  ;;  %v348_v30 = vld [vmem:[%s1044_s2 + $0x10] sm:$0xff]  ;;  %s708_s16 = scalar_lea.vmem %s997_s27, 1024  ;;  %p715_p0 = scmp.lt.s32.totalorder %s997_s27, %s713_s6 }
  0x1d   : > { %614 = vmatpush3.msra.mxu0 %v205_v12  ;;  %631 = vmatpush3.msra.mxu1 %v359_v19  ;;  %v261_v12 = vsub.s32 %v258_v52, %v963_v33  ;;  %p709_p11 = scmp.ne.s32.totalorder %s997_s27, %s708_s16  ;;  %p716_p1 = scmp.lt.s32.totalorder %s714_s7, %s708_s16 }
  0x1e   : > { %615 = vmatprep.subr.mxu0 %v770_v9  ;;  %632 = vmatprep.subr.mxu1 %v770_v9 }
  0x1f   : > { %616 = vmatpush3.msra.mxu0 %v204_v13  ;;  %633 = vmatpush3.msra.mxu1 %v358_v20  ;;  %v268_v13 = vsub.s32 %v265_v56, %v963_v33  ;;  %p710_p12 = pnand %p709_p11, %p833_p5  ;;  %p717_p2 = por %p716_p1, %p715_p0 }
  0x20   : > { %185 = vadd.xlane.f32.xlu0 %v860_v4  ;;  %187 = vadd.xlane.f32.xlu1 %v862_v5 }
  0x21   : > { %617 = vmatprep.subr.mxu0 %v770_v9  ;;  %634 = vmatprep.subr.mxu1 %v770_v9  ;;  %p711_p13 = pneg %p710_p12 }
  0x22   : > { %618 = vmatpush3.msra.mxu0 %v203_v14  ;;  %635 = vmatpush3.msra.mxu1 %v357_v21 }
  0x23   : > { %619 = vmatprep.subr.mxu0 %v770_v9  ;;  %636 = vmatprep.subr.mxu1 %v770_v9  ;;  %p718_p3 = pnand %p717_p2, %p711_p13 }
  0x24   : > { %189 = vadd.xlane.f32.xlu0 %v866_v6  ;;  %191 = vadd.xlane.f32.xlu1 %v868_v7 }
  0x25   : > { %620 = vmatpush3.msra.mxu0 %v202_v15  ;;  %637 = vmatpush3.msra.mxu1 %v356_v22 }
  0x26   : > { %621 = vmatprep.subr.mxu0 %v770_v9  ;;  %638 = vmatprep.subr.mxu1 %v770_v9 }
  0x27   : > { %622 = vmatpush3.msra.mxu0 %v201_v16  ;;  %639 = vmatpush3.msra.mxu1 %v355_v23 }
  0x28   : > { %640 = vmatprep.subr.mxu1 %v770_v9 }
  0x29   : > { %641 = vmatpush3.msra.mxu1 %v354_v24 }
  0x2a   : > { %642 = vmatprep.subr.mxu1 %v770_v9 }
  0x2b   : > { %643 = vmatpush3.msra.mxu1 %v353_v25  ;;  %v347_v25 = vld [vmem:[%s1044_s2 + $0x8] sm:$0xff] }
  0x2c   : > { %644 = vmatprep.subr.mxu1 %v770_v9 }
  0x2d   : > { %645 = vmatpush3.msra.mxu1 %v352_v26  ;;  %v346_v26 = vld [vmem:[%s1044_s2] sm:$0xff] }
  0x2e   : > { %646 = vmatprep.subr.mxu1 %v770_v9 }
  0x2f   : > { %647 = vmatpush3.msra.mxu1 %v351_v27 }
  0x30   : > { %648 = vmatprep.subr.mxu1 %v770_v9 }
  0x31   : > { %649 = vmatpush3.msra.mxu1 %v350_v28 }
  0x32   : > { %650 = vmatprep.subr.mxu1 %v770_v9 }
  0x33   : > { %651 = vmatpush3.msra.mxu1 %v349_v29 }
  0x34   : > { %652 = vmatprep.subr.mxu1 %v770_v9 }
  0x35   : > { %653 = vmatpush3.msra.mxu1 %v348_v30 }
  0x36   : > { %654 = vmatprep.subr.mxu1 %v770_v9 }
  0x37   : > { %655 = vmatpush3.msra.mxu1 %v347_v25 }
  0x38   : > { %656 = vmatprep.subr.mxu1 %v770_v9  ;;  %v440_v9 = vsub.s32 0, %v963_v33 }
  0x39   : > { %657 = vmatpush3.msra.mxu1 %v346_v26 }
  0xa1   : > { %v178_v36 = vpop.xlane.xlu0 %177  ;;  %v182_v38 = vpop.xlane.xlu1 %181 }
  0xa2   : > { %v193_v41 = vmul.f32 0.0078125, %v178_v36  ;;  %v195_v45 = vmul.f32 0.0078125, %v182_v38 }
  0xa4   : > { %v222_v53 = vrot.slane %v193_v41, %v221_v40  ;;  %v234_v57 = vrot.slane %v195_v45, %v233_v44 }
  0xa5   : > { %v180_v46 = vpop.xlane.xlu0 %179  ;;  %v184_v47 = vpop.xlane.xlu1 %183 }
  0xa6   : > { %v194_v49 = vmul.f32 0.0078125, %v180_v46  ;;  %v196_v50 = vmul.f32 0.0078125, %v184_v47 }
  0xa8   : > { %v227_v54 = vrot.slane %v194_v49, %v226_v42  ;;  %v241_v55 = vrot.slane %v196_v50, %v240_v43 }
  0xa9   : > { %v186_v58 = vpop.xlane.xlu0 %185  ;;  %v188_v60 = vpop.xlane.xlu1 %187 }
  0xaa   : > { %v229_v61 = vsel %vm228_vm1, %v227_v54, %v222_v53  ;;  %v197_v62 = vmul.f32 0.0078125, %v186_v58  ;;  %v198_v63 = vmul.f32 0.0078125, %v188_v60 }
  0xab   : > { %v236_v8 = vsel %vm235_vm2, %v234_v57, %v229_v61 }
  0xac   : > { %v243_v10 = vsel %vm242_vm3, %v241_v55, %v236_v8  ;;  %v248_v11 = vrot.slane %v197_v62, %v247_v51  ;;  %v255_v14 = vrot.slane %v198_v63, %v254_v59 }
  0xad   : > { %v190_v15 = vpop.xlane.xlu0 %189  ;;  %v192_v16 = vpop.xlane.xlu1 %191 }
  0xae   : > { %v250_v17 = vsel %vm249_vm4, %v248_v11, %v243_v10  ;;  %v199_v18 = vmul.f32 0.0078125, %v190_v15  ;;  %v200_v19 = vmul.f32 0.0078125, %v192_v16 }
  0xaf   : > { %v257_v22 = vsel %vm256_vm5, %v255_v14, %v250_v17 }
  0xb0   : > { %v262_v20 = vrot.slane %v199_v18, %v261_v12  ;;  %v269_v21 = vrot.slane %v200_v19, %v268_v13 }
  0xb2   : > { %v264_v23 = vsel %vm263_vm6, %v262_v20, %v257_v22 }
  0xb3   : > { %v271_v24 = vsel %vm270_vm7, %v269_v21, %v264_v23 }
  0xb4   : > { %624 = vmatmul.mubr.msk.f32.vlgmr.msra.gmra.mxu0 %vm272_vm8, %v271_v24 }
 0x174   : > { %v341_v27 = vpop.f32.mrf.mxu0 }
 0x175   : > { %v345_v28 = vmax.f32 %v341_v27, 0.0 }
 0x176   : > { %v625_v29 = vpop.f32.mrf.mxu0 }
 0x177   : > { %659 = vmatmul.mubr.f32.vlgmr.msra.gmra.mxu1 %v345_v28 }
 0x237   : > { %v428_v30 = vpop.f32.mrf.mxu1 }
 0x238   : > { %v573_v31 = vmul.f32 -1.442695, %v428_v30 }
 0x239   : > { %v660_v32 = vpop.f32.mrf.mxu1 }
 0x23a   : > { %704 = vpow2.f32 %v573_v31 }
 0x247   : > { %v705_v34 = vpop.eup %704 }
 0x248   : > { %v435_v35 = vadd.f32 1.0, %v705_v34 }
 0x24a   : > { %706 = vrcp.f32 %v435_v35 }
 0x257   : > { %v707_v36 = vpop.eup %706 }
 0x258   : > { %v441_v37 = vrot.slane %v707_v36, %v440_v9 }
 0x25a   : > { %447 = vbcast.lane.b32.xlu1 %v441_v37, 264  ;;  %443 = vbcast.lane.b32.xlu0 %v441_v37, 256 }
 0x25e   : > { %451 = vbcast.lane.b32.xlu1 %v441_v37, 272  ;;  %459 = vbcast.lane.b32.xlu0 %v441_v37, 288 }
 0x262   : > { %455 = vbcast.lane.b32.xlu1 %v441_v37, 280  ;;  %467 = vbcast.lane.b32.xlu0 %v441_v37, 304 }
 0x266   : > { %463 = vbcast.lane.b32.xlu1 %v441_v37, 296 }
 0x26a   : > { %471 = vbcast.lane.b32.xlu1 %v441_v37, 312 }
 0x2cc   : > { %v448_v38 = vpop.permute.xlu1 %447  ;;  %v444_v39 = vpop.permute.xlu0 %443 }
 0x2cd   : > { %v474_v40 = vmul.f32 %v448_v38, %v854_v2  ;;  %v473_v41 = vmul.f32 %v444_v39, %v848_v0 }
 0x2cf   : > { %482 = vst [vmem:[%s163_s25 + $0x8] sm:$0xff] %v474_v40  ;;  %481 = vst [vmem:[%s163_s25] sm:$0xff] %v473_v41 }
 0x2d0   : > { %v452_v33 = vpop.permute.xlu1 %451  ;;  %v460_v42 = vpop.permute.xlu0 %459 }
 0x2d1   : > { %v475_v43 = vmul.f32 %v452_v33, %v850_v1  ;;  %v477_v44 = vmul.f32 %v460_v42, %v860_v4 }
 0x2d3   : > { %483 = vst [vmem:[%s163_s25 + $0x10] sm:$0xff] %v475_v43  ;;  %485 = vst [vmem:[%s163_s25 + $0x20] sm:$0xff] %v477_v44 }
 0x2d4   : > { %v456_v45 = vpop.permute.xlu1 %455  ;;  %v468_v46 = vpop.permute.xlu0 %467 }
 0x2d5   : > { %v476_v47 = vmul.f32 %v456_v45, %v856_v3  ;;  %v479_v2 = vmul.f32 %v468_v46, %v866_v6 }
 0x2d7   : > { %484 = vst [vmem:[%s163_s25 + $0x18] sm:$0xff] %v476_v47  ;;  %487 = vst [vmem:[%s163_s25 + $0x30] sm:$0xff] %v479_v2 }
 0x2d8   : > { %v464_v0 = vpop.permute.xlu1 %463 }
 0x2d9   : > { %v478_v48 = vmul.f32 %v464_v0, %v862_v5 }
 0x2db   : > { %486 = vst [vmem:[%s163_s25 + $0x28] sm:$0xff] %v478_v48 }
 0x2dc   : > { %v472_v1 = vpop.permute.xlu1 %471 }
 0x2dd   : > { %v480_v3 = vmul.f32 %v472_v1, %v868_v7 }
 0x2df   : > { %488 = vst [vmem:[%s163_s25 + $0x38] sm:$0xff] %v480_v3 }
 0x2e0   : > { %721 = shalt.err (!%p718_p3)
}
 0x2e1   : > { %s722_s8 = scalar_lea.hbm %s995_s30, 1024  ;;  %s726_s11 = scalar_lea.hbm %s1045_s3, 2048 }
 0x2e2   : > { %p723_p4 = scmp.ne.s32.totalorder %s995_s30, %s722_s8  ;;  %p727_p9 = scmp.lt.s32.totalorder %s995_s30, %s1045_s3 }
 0x2e3   : > { %p728_p10 = scmp.lt.s32.totalorder %s726_s11, %s722_s8 }
 0x2e4   : > { %p724_p7 = pnand %p723_p4, %p833_p5 }
 0x2e5   : > { %p729_p11 = por %p728_p10, %p727_p9 }
 0x2e6   : > { %p725_p8 = pneg %p724_p7 }
 0x2e8   : > { %p730_p12 = pnand %p729_p11, %p725_p8 }
 0x2ea   : > { %733 = shalt.err (!%p730_p12)
}
 0x2eb   : > { %s773_s20 = smov 128   ;;  %s774_s24 = smov 8  }
 0x2ec   : > { %661 = dma.vmem_to_hbm [thread:$0]  (%p833_p5), %s997_s27, 1024, %s995_s30, %s1002_s4, %s773_s20, %s773_s20, %s774_s24  }
 0x2ed PF: > { %p667_p13 = scmp.ge.s32.totalorder %s768_s15, 2  ;;  %s518_s25 = sand.u32 1, %s756_s12  }
 0x2ee   : > { %s519_s26 = scalar_lea.sflag [#allocation3], %s518_s25 }
 0x2ef   : > { %p664_p0 = pnand %p667_p13, %p837_p6 }
 0x2f1   : > { %p665_p1 = pneg %p664_p0 }
 0x2f3   : > { %751 = dma.done.wait (%p665_p1), %s519_s26, 1024  }
 0x2f4   : > { %753 = vsyncadd (%p665_p1), %s519_s26, 4294966272  ;;  %p13_p2 = scmp.ge.s32.totalorder %s820_s18, 4   ;;  %s1048_s12 = smov %s760_s13 }
 0x2f5   : > { %s1049_s13 = smov %s764_s14  ;;  %s1050_s14 = smov %s831_s21 }
 0x2f6   : > { %s1051_s15 = smov %s820_s18  ;;  %15 = sbr.rel (!%p13_p2) target bundleno = 3 (0x3), region = 67 }
 0x2fb   :  { %524 = vsyncpa [#allocation3], 1 }
 0x2fc   :  { %526 = vsyncpa [#allocation3 + $0x1], 1 }

</bundles_post_ra>
